<compile_context>
chip_gen: v7x
topology: tpu7x:2x2x1
jax: 0.10.0
libtpu: 0.0.40
codegen_flags: <defaults>
</compile_context>

<pallas_src>
from typing import Tuple

import jax
import jax.numpy as jnp
from jax.experimental import pallas as pl
from jax.experimental.pallas import tpu as pltpu


# ----------------------------------------------------------------------------
# Pallas kernel: pass-through of the routed ("guarded") tensor
# ----------------------------------------------------------------------------
def _guard_copy_kernel(x_ref, o_ref):
    # The guard() in the original module is a CUDA stream-event wait; on TPU
    # the equivalent ordering is enforced by this kernel's data dependence.
    o_ref[...] = x_ref[...]


_SINGLE_BLOCK_BYTES = 1 << 20   # <= 1 MiB: one block, no grid machinery
_TARGET_BLOCK_BYTES = 1 << 20   # ~1 MiB per block when tiling (x4 buffered = 4 MiB VMEM)


def _choose_lane_width(numel: int):
    """Widest lane-dense last dim (multiple of 128) that divides numel."""
    for lanes in (4096, 2048, 1024, 512, 256, 128):
        if numel % lanes == 0:
            return lanes
    return None


def _pallas_guard_passthrough(x: jax.Array) -> jax.Array:
    """Route `x` through a Pallas pass-through kernel (values untouched)."""
    numel = int(x.size)
    lanes = _choose_lane_width(numel)
    if lanes is None:
        # Ragged numel (not a multiple of 128): no copy, just an ordering edge.
        return jax.lax.optimization_barrier(x)

    rows = numel // lanes
    itemsize = x.dtype.itemsize
    x2d = x.reshape(rows, lanes)

    if rows * lanes * itemsize <= _SINGLE_BLOCK_BYTES:
        # Small tensor: single block, whole array in VMEM, no grid overhead.
        out2d = pl.pallas_call(
            _guard_copy_kernel,
            out_shape=jax.ShapeDtypeStruct((rows, lanes), x2d.dtype),
            input_output_aliases={0: 0},
        )(x2d)
        return out2d.reshape(x.shape)

    # Tiled path: row-tiled grid, lane-dense blocks, parallel row axis.
    block_rows = min(rows, max(8, (_TARGET_BLOCK_BYTES // (lanes * itemsize)) // 8 * 8))
    grid_rows = pl.cdiv(rows, block_rows)

    out2d = pl.pallas_call(
        _guard_copy_kernel,
        out_shape=jax.ShapeDtypeStruct((rows, lanes), x2d.dtype),
        grid=(grid_rows,),
        in_specs=[pl.BlockSpec((block_rows, lanes), lambda i: (i, 0))],
        out_specs=pl.BlockSpec((block_rows, lanes), lambda i: (i, 0)),
        input_output_aliases={0: 0},
        compiler_params=pltpu.CompilerParams(
            dimension_semantics=("parallel",),
        ),
    )(x2d)
    return out2d.reshape(x.shape)


# ----------------------------------------------------------------------------
# Python-side glue replicating the PyTorch module logic
# ----------------------------------------------------------------------------
def _get_target_input(inputs, path_id: int):
    """JAX analogue of brt's _get_target_input (tuple/list routing)."""
    if isinstance(inputs, (tuple, list)):
        if len(inputs) > path_id and isinstance(inputs[path_id], jax.Array):
            return inputs[path_id]
        return _get_target_input(inputs[0], path_id)
    if isinstance(inputs, jax.Array) and path_id == 0:
        return inputs
    raise ValueError("Invalid input type: {}".format(type(inputs)))


class OnDemandGuarder:
    """Pallas/JAX port of brt.runtime.memory_planner.OnDemandGuarder.

    No parameters (MemoryPlanner holds only bookkeeping dicts); forward is
    an identity on `inputs` gated by a (TPU: no-op) stream-event guard.
    """

    def __init__(self, path_id: int, event_id: int):
        self.path_id = path_id
        self.event_id = event_id

    def guard(self, event_id: int):
        # TODO(synk): CUDA stream-event wait has no Pallas/TPU equivalent;
        # ordering is provided by the data dependence of the pass-through.
        del event_id

    def forward(self, inputs):
        target = _get_target_input(inputs, self.path_id)
        if target.size > 0:  # numel() > 0 -- static under JAX shapes
            self.guard(self.event_id)
            routed = _pallas_guard_passthrough(target)
        else:
            routed = target

        # Return `inputs` with the routed tensor swapped in at path_id
        # (values are identical to the originals -> identity forward).
        if isinstance(inputs, (tuple, list)):
            out = list(inputs)
            if len(out) > self.path_id and isinstance(out[self.path_id], jax.Array):
                out[self.path_id] = routed
            return tuple(out) if isinstance(inputs, tuple) else out
        return routed

    __call__ = forward


# ----------------------------------------------------------------------------
# Demo
# ----------------------------------------------------------------------------
if __name__ == "__main__":
    key = jax.random.PRNGKey(0)
    k0, k1, k2 = jax.random.split(key, 3)

    # Small scatter-style inputs, NCHW layout (single-block kernel path).
    x_path0 = jax.random.normal(k0, (2, 4, 16, 16), dtype=jnp.float32)
    x_path1 = jax.random.normal(k1, (2, 4, 16, 16), dtype=jnp.float32)
    inputs: Tuple[jax.Array, jax.Array] = (x_path0, x_path1)

    guarder = OnDemandGuarder(path_id=1, event_id=0)
    outputs = guarder(inputs)
    outputs = jax.tree_util.tree_map(jax.block_until_ready, outputs)

    # Forward must be an exact identity on `inputs`.
    assert len(outputs) == len(inputs)
    for o, x in zip(outputs, inputs):
        assert o.shape == x.shape and o.dtype == x.dtype
        assert bool(jnp.array_equal(o, x))

    # Larger input exercising the tiled, lane-dense, parallel-grid path.
    x_big = jax.random.normal(k2, (2, 4, 256, 256), dtype=jnp.float32)
    guarder0 = OnDemandGuarder(path_id=0, event_id=0)
    out_big = guarder0((x_big,))
    out_big = jax.tree_util.tree_map(jax.block_until_ready, out_big)
    assert out_big[0].shape == x_big.shape and out_big[0].dtype == x_big.dtype
    assert bool(jnp.array_equal(out_big[0], x_big))

    print("KERNEL_OK")
</pallas_src>

<mosaic_0001>
module attributes {stable_mosaic.version = 11 : i64} {
  func.func @_guard_copy_kernel(%arg0: memref<1x2048xf32, #tpu.memory_space<vmem>>, %arg1: memref<1x2048xf32, #tpu.memory_space<vmem>>) attributes {dimension_semantics = [], scalar_prefetch = 0 : i64, scratch_operands = 0 : i64, tpu.core_type = #tpu.core_type<tc>} {
    %c0 = arith.constant 0 : index
    %c0_0 = arith.constant 0 : index
    %0 = vector.load %arg0[%c0, %c0_0] : memref<1x2048xf32, #tpu.memory_space<vmem>>, vector<1x2048xf32>
    %c0_1 = arith.constant 0 : index
    %c0_2 = arith.constant 0 : index
    %1 = vector.load %arg1[%c0_1, %c0_2] : memref<1x2048xf32, #tpu.memory_space<vmem>>, vector<1x2048xf32>
    tpu.vector_store %arg1[%c0_1, %c0_2], %0 {strides = array<i32>} : memref<1x2048xf32, #tpu.memory_space<vmem>>, vector<1x2048xf32>,
    return
  }
}

</mosaic_0001>

<bundles_post_ra>
// kernel: tpu_custom_call.1
= control target key start
LH: loop header
LB: loop body
LE: loop exit
PB: predicated region body
PF: predicated region fallthrough
CT: control target
= control target key end

     0   :  { %6 = vsyncpa [#allocation3], 0  ;;  %s126_s0 = inlined_call_operand.hbm [shape: f32[1,2048], index: 0, kind: input, shape index: {}, may-alias: {0,1}]   ;;  %s127_s1 = inlined_call_operand.hbm [shape: f32[1,2048], index: 1, kind: output, shape index: {}, may-alias: {0,1}]  }
   0x1   :  { %7 = vsyncpa [#allocation4], 0  ;;  %s90_s6 = smov [#allocation2]   ;;  %s42_s10 = scalar_lea.hbm %s126_s0, 256 }
   0x2   :  { %s14_s7 = sshll.u32 %s90_s6, 4  ;;  %p43_p0 = scmp.ne.s32.totalorder %s126_s0, %s42_s10  ;;  %s15_s7 = int_to_ptr.vmem [resolvable:$true] %s14_s7 }
   0x3   :  { %p46_p1 = scmp.lt.u32.totalorder %s42_s10, %s126_s0 }
   0x5   :  { %p48_p2 = pnand %p46_p1, %p43_p0 }
   0x7   :  { %51 = shalt.err (!%p48_p2)
}
   0x8   :  { %s52_s15 = scalar_lea.vmem %s15_s7, 256  ;;  %p57_p4 = scmp.lt.s32.totalorder %s15_s7, %s15_s7 }
   0x9   :  { %p53_p3 = scmp.ne.s32.totalorder %s15_s7, %s52_s15  ;;  %p58_p5 = scmp.lt.s32.totalorder %s52_s15, %s52_s15 }
   0xb   :  { %p59_p6 = por %p58_p5, %p57_p4 }
   0xd   :  { %p60_p7 = pnand %p59_p6, %p53_p3 }
   0xf   :  { %63 = shalt.err (!%p60_p7)
}
  0x10   :  { %17 = dma.hbm_to_vmem [thread:$0]  %s126_s0, 256, %s15_s7, [#allocation3]  }
  0x11   :  { %86 = dma.done.wait [#allocation3], 256  }
  0x12   :  { %87 = vsyncadd [#allocation3], 4294967040  ;;  %s91_s18 = smov [#allocation5]   ;;  %v21_v0 = vld [vmem:[#allocation2] sm:$0xff]  ;;  %v22_v1 = vld [vmem:[#allocation2 + $0x8] sm:$0xff] }
  0x13   :  { %s31_s19 = sshll.u32 %s91_s18, 4  ;;  %23 = vst [vmem:[#allocation5] sm:$0xff] %v21_v0  ;;  %24 = vst [vmem:[#allocation5 + $0x8] sm:$0xff] %v22_v1  ;;  %s32_s19 = int_to_ptr.vmem [resolvable:$true] %s31_s19 }
  0x14   :  { %s64_s20 = scalar_lea.vmem %s32_s19, 256  ;;  %p69_p9 = scmp.lt.s32.totalorder %s32_s19, %s32_s19 }
  0x15   :  { %p65_p8 = scmp.ne.s32.totalorder %s32_s19, %s64_s20  ;;  %p70_p10 = scmp.lt.s32.totalorder %s64_s20, %s64_s20 }
  0x17   :  { %p71_p11 = por %p70_p10, %p69_p9 }
  0x19   :  { %p72_p12 = pnand %p71_p11, %p65_p8 }
  0x1b   :  { %75 = shalt.err (!%p72_p12)
}
  0x1c   :  { %s76_s0 = scalar_lea.hbm %s127_s1, 256 }
  0x1d   :  { %p77_p13 = scmp.ne.s32.totalorder %s127_s1, %s76_s0  ;;  %p80_p0 = scmp.lt.u32.totalorder %s76_s0, %s127_s1 }
  0x1f   :  { %p82_p1 = pnand %p80_p0, %p77_p13 }
  0x21   :  { %85 = shalt.err (!%p82_p1)
}
  0x22   :  { %34 = dma.vmem_to_hbm [thread:$0]  %s32_s19, 256, %s127_s1, [#allocation4]  }
  0x23   :  { %88 = dma.done.wait [#allocation4], 256  }
  0x24   :  { %89 = vsyncadd [#allocation4], 4294967040 }
  0x25   :  { %38 = vsyncpa [#allocation3], 1 }
  0x26   :  { %39 = vsyncpa [#allocation4], 1 }

</bundles_post_ra>
